<compile_context>
chip_gen: v7x
topology: tpu7x:2x2x1
jax: 0.10.0
libtpu: 0.0.40
codegen_flags: <defaults>
</compile_context>

<pallas_src>
import jax
import jax.numpy as jnp
from jax.experimental import pallas as pl
from jax.experimental.pallas import tpu as pltpu

INPUT_DIM = 14
HIDDEN_DIM = 18
OUT_DIM = 1
OUT_PAD = 128                 # lane-dense output width; wrapper slices to OUT_DIM
G = 4 * HIDDEN_DIM            # 72  (fused gates i,f,g,o)
G2 = 2 * G                    # 144 (forward + reverse gates, one GEMM)


def _align8(n):
    return -(-n // 8) * 8


# --------------------------------------------------------------------------
# Parameter slab layouts (row offsets 8-aligned, lane-dense, f32).
#   slab  : 128 lanes wide  -> recurrence Whh + regressor head
#   wproj : 144 lanes wide  -> merged [Wih_f | Wih_r] and [b_f | b_r]
# Reverse-direction Whh is NOT packed: with a zero initial state its
# contribution to encoder_outputs[:, -1] is exactly zero (see kernel comment).
# --------------------------------------------------------------------------
_SLAB_FIELDS = [
    ("whh_f", HIDDEN_DIM),        # (H, 4H)   forward W_hh^T (i/f/o cols pre-scaled 0.5)
    ("w1a", HIDDEN_DIM),          # (H, H)    regressor L1, h_fwd half
    ("w1b", HIDDEN_DIM),          # (H, H)    regressor L1, h_bwd half
    ("b1", 1),                    # (1, H)
    ("w2", HIDDEN_DIM),           # (H, H//2)
    ("b2", 1),                    # (1, H//2)
    ("w3", HIDDEN_DIM // 2),      # (H//2, 1) -> zero-padded to OUT_PAD lanes
    ("b3", 1),                    # (1, 1)    -> zero-padded to OUT_PAD lanes
]
_WPROJ_FIELDS = [
    ("wih_fr", INPUT_DIM),        # (D, 8H)   [fwd | rev] W_ih^T (i/f/o cols pre-scaled)
    ("b_fr", 1),                  # (1, 8H)   [fwd | rev] b_ih + b_hh (i/f/o pre-scaled)
]


def _layout(fields):
    rows, r = {}, 0
    for name, n in fields:
        rows[name] = r
        r += _align8(n)
    return rows, r


_SLAB_ROW, SLAB_ROWS = _layout(_SLAB_FIELDS)       # 136 rows
_WPROJ_ROW, WPROJ_ROWS = _layout(_WPROJ_FIELDS)    # 24 rows
SLAB_LANES = 128
WPROJ_LANES = G2


def _pack(row_map, total_rows, lanes, tensors):
    slab = jnp.zeros((total_rows, lanes), jnp.float32)
    for name, arr in tensors.items():
        r, c = arr.shape
        slab = slab.at[row_map[name]:row_map[name] + r, 0:c].set(arr.astype(jnp.float32))
    return slab


# --------------------------------------------------------------------------
# Kernel
# --------------------------------------------------------------------------
def lstm_kernel(x_ref, wproj_ref, slab_ref, out_ref):
    B, TD = x_ref.shape
    D = INPUT_DIM
    T = TD // D
    BP = out_ref.shape[0]          # batch padded to a full sublane group (8)
    H = HIDDEN_DIM
    H2 = H // 2

    def sparam(name, nrows, ncols):
        r0 = _SLAB_ROW[name]
        return slab_ref[r0:r0 + nrows, 0:ncols]        # static slices of the slab

    whh_f = sparam("whh_f", H, G)
    w1a = sparam("w1a", H, H)
    w1b = sparam("w1b", H, H)
    b1 = sparam("b1", 1, H)
    w2 = sparam("w2", H, H2)
    b2 = sparam("b2", 1, H2)
    w3 = sparam("w3", H2, OUT_PAD)
    b3 = sparam("b3", 1, OUT_PAD)

    r0 = _WPROJ_ROW["wih_fr"]
    wih_fr = wproj_ref[r0:r0 + D, 0:G2]                # (D, 8H) merged fwd|rev
    r0 = _WPROJ_ROW["b_fr"]
    b_fr = wproj_ref[r0:r0 + 1, 0:G2]                  # (1, 8H)

    # ---- in-kernel re-layout (replaces wrapper-side transpose/reshape/pad) ----
    x_raw = x_ref[...]                                 # (B, T*D), natural layout
    if BP > B:
        xpad = jnp.concatenate(
            [x_raw, jnp.zeros((BP - B, TD), jnp.float32)], axis=0)   # (BP, T*D)
    else:
        xpad = x_raw
    # time-major (T*BP, D): row index = t*BP + b, built from static lane slices
    # so every per-step row block below is 8-sublane aligned.
    xtm = jnp.concatenate([xpad[:, t * D:(t + 1) * D] for t in range(T)], axis=0)

    # ---- hoisted input projection for ALL timesteps, fwd+rev fused ------------
    # One (T*BP, D) x (D, 8H) GEMM replaces T*4 per-gate matmuls plus the
    # separate reverse-direction projection (biases pre-summed host-side).
    xp = jnp.dot(xtm, wih_fr, preferred_element_type=jnp.float32) + b_fr   # (T*BP, 8H)

    def gate_act(gates):
        # i/f/o pre-activations are pre-scaled by 0.5 host-side, so a SINGLE
        # tanh yields sigmoid (0.5*tanh(z/2)+0.5) for i/f/o and tanh for g.
        th = jnp.tanh(gates)
        sg = th * 0.5 + 0.5
        return sg[:, 0:H], sg[:, H:2 * H], th[:, 2 * H:3 * H], sg[:, 3 * H:4 * H]

    # ---- forward direction: fully unrolled serial recurrence ------------------
    h = jnp.zeros((BP, H), jnp.float32)
    c = jnp.zeros((BP, H), jnp.float32)
    for t in range(T):                     # T is small & static -> full unroll
        gates = xp[t * BP:(t + 1) * BP, 0:G] + jnp.dot(
            h, whh_f, preferred_element_type=jnp.float32)
        i, f, g, o = gate_act(gates)
        c = f * c + i * g
        h = o * jnp.tanh(c)
    h_fwd = h

    # ---- reverse direction -----------------------------------------------------
    # encoder_outputs[:, -1] of the reverse pass is the hidden state after
    # processing only x[T-1] from the zero initial state, so one cell step is
    # exact; with h0 = c0 = 0 the h @ Whh_r and f * c0 terms vanish.
    # NOTE: valid because the head reads encoder_outputs[:, -1], NOT reverse h_n.
    i, f, g, o = gate_act(xp[(T - 1) * BP:T * BP, G:G2])
    h_bwd = o * jnp.tanh(i * g)

    # ---- regressor: Linear -> ReLU -> Linear -> ReLU -> Linear -----------------
    # concat([h_fwd, h_bwd]) replaced by two matmul-accumulates on split w1.
    # TODO(synk): Dropout layers are identity here (eval-mode forward).
    h1 = jnp.maximum(
        jnp.dot(h_fwd, w1a, preferred_element_type=jnp.float32)
        + jnp.dot(h_bwd, w1b, preferred_element_type=jnp.float32)
        + b1, 0.0)
    h2v = jnp.maximum(
        jnp.dot(h1, w2, preferred_element_type=jnp.float32) + b2, 0.0)
    out_ref[...] = (
        jnp.dot(h2v, w3, preferred_element_type=jnp.float32) + b3)  # (BP, 128) unmasked


# --------------------------------------------------------------------------
# Wrapper: no XLA-side transpose/reshape/pad — src goes straight to the kernel.
# --------------------------------------------------------------------------
def lstm_forward(src, params):
    B = src.shape[0]
    x = src.reshape(B, -1).astype(jnp.float32)       # mirrors src.view(B, -1, D)
    assert x.shape[1] % INPUT_DIM == 0
    BP = _align8(B)

    vmem = pl.BlockSpec(memory_space=pltpu.MemorySpace.VMEM)
    out = pl.pallas_call(
        lstm_kernel,
        out_shape=jax.ShapeDtypeStruct((BP, OUT_PAD), jnp.float32),
        in_specs=[vmem, vmem, vmem],
        out_specs=vmem,
        # No grid: total footprint is ~100 KiB, fully VMEM-resident.
    )(x, params["wproj"], params["slab"])
    return out[:B, :OUT_DIM]


# --------------------------------------------------------------------------
# Deterministic parameter construction (PyTorch-style uniform init)
# --------------------------------------------------------------------------
def init_params(key):
    H, D, O = HIDDEN_DIM, INPUT_DIM, OUT_DIM
    ks = jax.random.split(key, 16)
    u = lambda k, shape, bound: jax.random.uniform(k, shape, jnp.float32, -bound, bound)
    kH = 1.0 / (H ** 0.5)

    # nn.LSTM parameters (gate order i,f,g,o), forward + reverse directions
    w_ih_f = u(ks[0], (4 * H, D), kH)
    w_hh_f = u(ks[1], (4 * H, H), kH)
    b_ih_f = u(ks[2], (4 * H,), kH)
    b_hh_f = u(ks[3], (4 * H,), kH)
    w_ih_r = u(ks[4], (4 * H, D), kH)
    w_hh_r = u(ks[5], (4 * H, H), kH)
    b_ih_r = u(ks[6], (4 * H,), kH)
    b_hh_r = u(ks[7], (4 * H,), kH)

    # regressor: Linear(2H, H), Linear(H, H//2), Linear(H//2, O)
    w1 = u(ks[8], (H, 2 * H), 1.0 / ((2 * H) ** 0.5))
    b1 = u(ks[9], (H,), 1.0 / ((2 * H) ** 0.5))
    w2 = u(ks[10], (H // 2, H), kH)
    b2 = u(ks[11], (H // 2,), kH)
    w3 = u(ks[12], (O, H // 2), 1.0 / ((H // 2) ** 0.5))
    b3 = u(ks[13], (O,), 1.0 / ((H // 2) ** 0.5))

    raw = dict(w_ih_f=w_ih_f, w_hh_f=w_hh_f, b_ih_f=b_ih_f, b_hh_f=b_hh_f,
               w_ih_r=w_ih_r, w_hh_r=w_hh_r, b_ih_r=b_ih_r, b_hh_r=b_hh_r,
               w1=w1, b1=b1, w2=w2, b2=b2, w3=w3, b3=b3)

    # Kernel layout: everything pre-transposed, biases pre-summed, i/f/o gate
    # columns pre-scaled by 0.5 (single-tanh activation trick), forward/reverse
    # input projections merged side-by-side, packed into two lane-dense slabs.
    scale_ifo = jnp.concatenate([
        jnp.full((2 * H,), 0.5, jnp.float32),    # i, f
        jnp.ones((H,), jnp.float32),             # g (tanh gate, unscaled)
        jnp.full((H,), 0.5, jnp.float32),        # o
    ])

    wih_f_k = w_ih_f.T * scale_ifo                       # (D, 4H)
    whh_f_k = w_hh_f.T * scale_ifo                       # (H, 4H)
    b_f_k = ((b_ih_f + b_hh_f) * scale_ifo)[None, :]     # (1, 4H)
    wih_r_k = w_ih_r.T * scale_ifo                       # (D, 4H)
    b_r_k = ((b_ih_r + b_hh_r) * scale_ifo)[None, :]     # (1, 4H)

    wih_fr = jnp.concatenate([wih_f_k, wih_r_k], axis=1)  # (D, 8H)
    b_fr = jnp.concatenate([b_f_k, b_r_k], axis=1)        # (1, 8H)

    slab = _pack(_SLAB_ROW, SLAB_ROWS, SLAB_LANES, {
        "whh_f": whh_f_k,
        "w1a": w1[:, :H].T,                      # feat = [h_fwd | h_bwd]
        "w1b": w1[:, H:].T,
        "b1": b1[None, :],
        "w2": w2.T,
        "b2": b2[None, :],
        "w3": w3.T,                              # (H//2, 1), zero-padded lanes
        "b3": b3[None, :],
    })
    wproj = _pack(_WPROJ_ROW, WPROJ_ROWS, WPROJ_LANES, {
        "wih_fr": wih_fr,
        "b_fr": b_fr,
    })
    return {"slab": slab, "wproj": wproj}, raw


# --------------------------------------------------------------------------
# Pure-JAX reference (mirrors the PyTorch forward, eval mode)
# --------------------------------------------------------------------------
def reference_forward(src, raw):
    H = HIDDEN_DIM
    B = src.shape[0]
    x = src.reshape(B, -1, INPUT_DIM)
    T = x.shape[1]

    def cell(x_t, h, c, w_ih, w_hh, b_ih, b_hh):
        gates = x_t @ w_ih.T + h @ w_hh.T + b_ih + b_hh
        i = jax.nn.sigmoid(gates[:, 0 * H:1 * H])
        f = jax.nn.sigmoid(gates[:, 1 * H:2 * H])
        g = jnp.tanh(gates[:, 2 * H:3 * H])
        o = jax.nn.sigmoid(gates[:, 3 * H:4 * H])
        c = f * c + i * g
        h = o * jnp.tanh(c)
        return h, c

    h = jnp.zeros((B, H)); c = jnp.zeros((B, H))
    for t in range(T):
        h, c = cell(x[:, t], h, c, raw["w_ih_f"], raw["w_hh_f"],
                    raw["b_ih_f"], raw["b_hh_f"])
    h_fwd = h
    h_bwd, _ = cell(x[:, T - 1], jnp.zeros((B, H)), jnp.zeros((B, H)),
                    raw["w_ih_r"], raw["w_hh_r"], raw["b_ih_r"], raw["b_hh_r"])
    feat = jnp.concatenate([h_fwd, h_bwd], axis=-1)
    h1 = jnp.maximum(feat @ raw["w1"].T + raw["b1"], 0.0)
    h2 = jnp.maximum(h1 @ raw["w2"].T + raw["b2"], 0.0)
    return h2 @ raw["w3"].T + raw["b3"]


# --------------------------------------------------------------------------
if __name__ == "__main__":
    key = jax.random.PRNGKey(0)
    k_param, k_data = jax.random.split(key)

    params, raw = init_params(k_param)

    B, T = 2, 8
    # src is flat per sample; forward views it to (B, T, INPUT_DIM)
    src = jax.random.normal(k_data, (B, T * INPUT_DIM), jnp.float32)

    out = jax.block_until_ready(lstm_forward(src, params))
    assert out.shape == (B, OUT_DIM) and out.dtype == jnp.float32

    ref = reference_forward(src, raw)
    # 5e-3 tolerance: catches layout/gate-order/repacking bugs (O(0.1-1) errors)
    # with large margin while absorbing default-precision MXU f32 matmul rounding
    # and the tanh-vs-sigmoid EUP approximation differences.
    assert jnp.allclose(out, ref, rtol=5e-3, atol=5e-3), (out, ref)

    print("KERNEL_OK")
</pallas_src>

<mosaic_0001>
module attributes {stable_mosaic.version = 11 : i64} {
  func.func @lstm_kernel(%arg0: memref<2x112xf32, #tpu.memory_space<vmem>>, %arg1: memref<24x144xf32, #tpu.memory_space<vmem>>, %arg2: memref<136x128xf32, #tpu.memory_space<vmem>>, %arg3: memref<8x128xf32, #tpu.memory_space<vmem>>) attributes {dimension_semantics = [], scalar_prefetch = 0 : i64, scratch_operands = 0 : i64, tpu.core_type = #tpu.core_type<tc>} {
    %c0 = arith.constant 0 : index
    %c0_0 = arith.constant 0 : index
    %0 = vector.load %arg2[%c0, %c0_0] : memref<136x128xf32, #tpu.memory_space<vmem>>, vector<18x72xf32>
    %c24 = arith.constant 24 : index
    %c0_1 = arith.constant 0 : index
    %1 = vector.load %arg2[%c24, %c0_1] : memref<136x128xf32, #tpu.memory_space<vmem>>, vector<18x18xf32>
    %c48 = arith.constant 48 : index
    %c0_2 = arith.constant 0 : index
    %2 = vector.load %arg2[%c48, %c0_2] : memref<136x128xf32, #tpu.memory_space<vmem>>, vector<18x18xf32>
    %c72 = arith.constant 72 : index
    %c0_3 = arith.constant 0 : index
    %3 = vector.load %arg2[%c72, %c0_3] : memref<136x128xf32, #tpu.memory_space<vmem>>, vector<1x18xf32>
    %c80 = arith.constant 80 : index
    %c0_4 = arith.constant 0 : index
    %4 = vector.load %arg2[%c80, %c0_4] : memref<136x128xf32, #tpu.memory_space<vmem>>, vector<18x9xf32>
    %c104 = arith.constant 104 : index
    %c0_5 = arith.constant 0 : index
    %5 = vector.load %arg2[%c104, %c0_5] : memref<136x128xf32, #tpu.memory_space<vmem>>, vector<1x9xf32>
    %c112 = arith.constant 112 : index
    %c0_6 = arith.constant 0 : index
    %6 = vector.load %arg2[%c112, %c0_6] : memref<136x128xf32, #tpu.memory_space<vmem>>, vector<9x128xf32>
    %c128 = arith.constant 128 : index
    %c0_7 = arith.constant 0 : index
    %7 = vector.load %arg2[%c128, %c0_7] : memref<136x128xf32, #tpu.memory_space<vmem>>, vector<1x128xf32>
    %c0_8 = arith.constant 0 : index
    %c0_9 = arith.constant 0 : index
    %8 = vector.load %arg1[%c0_8, %c0_9] : memref<24x144xf32, #tpu.memory_space<vmem>>, vector<14x144xf32>
    %c16 = arith.constant 16 : index
    %c0_10 = arith.constant 0 : index
    %9 = vector.load %arg1[%c16, %c0_10] : memref<24x144xf32, #tpu.memory_space<vmem>>, vector<1x144xf32>
    %c0_11 = arith.constant 0 : index
    %c0_12 = arith.constant 0 : index
    %10 = vector.load %arg0[%c0_11, %c0_12] : memref<2x112xf32, #tpu.memory_space<vmem>>, vector<2x112xf32>
    %cst = arith.constant 0.000000e+00 : f32
    %11 = vector.broadcast %cst : f32 to vector<6x112xf32>
    %12 = tpu.concatenate %10, %11 in 0 : vector<2x112xf32>, vector<6x112xf32> -> vector<8x112xf32>
    %13 = vector.extract_strided_slice %12 {offsets = [0, 0], sizes = [8, 14], strides = [1, 1]} : vector<8x112xf32> to vector<8x14xf32>
    %14 = vector.extract_strided_slice %12 {offsets = [0, 14], sizes = [8, 14], strides = [1, 1]} : vector<8x112xf32> to vector<8x14xf32>
    %15 = vector.extract_strided_slice %12 {offsets = [0, 28], sizes = [8, 14], strides = [1, 1]} : vector<8x112xf32> to vector<8x14xf32>
    %16 = vector.extract_strided_slice %12 {offsets = [0, 42], sizes = [8, 14], strides = [1, 1]} : vector<8x112xf32> to vector<8x14xf32>
    %17 = vector.extract_strided_slice %12 {offsets = [0, 56], sizes = [8, 14], strides = [1, 1]} : vector<8x112xf32> to vector<8x14xf32>
    %18 = vector.extract_strided_slice %12 {offsets = [0, 70], sizes = [8, 14], strides = [1, 1]} : vector<8x112xf32> to vector<8x14xf32>
    %19 = vector.extract_strided_slice %12 {offsets = [0, 84], sizes = [8, 14], strides = [1, 1]} : vector<8x112xf32> to vector<8x14xf32>
    %20 = vector.extract_strided_slice %12 {offsets = [0, 98], sizes = [8, 14], strides = [1, 1]} : vector<8x112xf32> to vector<8x14xf32>
    %21 = tpu.concatenate %13, %14, %15, %16, %17, %18, %19, %20 in 0 : vector<8x14xf32>, vector<8x14xf32>, vector<8x14xf32>, vector<8x14xf32>, vector<8x14xf32>, vector<8x14xf32>, vector<8x14xf32>, vector<8x14xf32> -> vector<64x14xf32>
    %cst_13 = arith.constant dense<0.000000e+00> : vector<64x144xf32>
    %22 = tpu.matmul %21, %8, %cst_13 {dimension_numbers = #tpu.dot_dimension_numbers<[1], [0], [0], [1], [0, 0, 1, 1], [], []>} : vector<64x14xf32>, vector<14x144xf32>, vector<64x144xf32> -> vector<64x144xf32>
    %23 = vector.broadcast %9 : vector<1x144xf32> to vector<64x144xf32>
    %24 = arith.addf %22, %23 : vector<64x144xf32>
    %cst_14 = arith.constant 0.000000e+00 : f32
    %25 = vector.broadcast %cst_14 : f32 to vector<8x18xf32>
    %cst_15 = arith.constant 0.000000e+00 : f32
    %26 = vector.broadcast %cst_15 : f32 to vector<8x18xf32>
    %27 = vector.extract_strided_slice %24 {offsets = [0, 0], sizes = [8, 72], strides = [1, 1]} : vector<64x144xf32> to vector<8x72xf32>
    %cst_16 = arith.constant dense<0.000000e+00> : vector<8x72xf32>
    %28 = tpu.matmul %25, %0, %cst_16 {dimension_numbers = #tpu.dot_dimension_numbers<[1], [0], [0], [1], [0, 0, 1, 1], [], []>} : vector<8x18xf32>, vector<18x72xf32>, vector<8x72xf32> -> vector<8x72xf32>
    %29 = arith.addf %27, %28 : vector<8x72xf32>
    %30 = math.tanh %29 : vector<8x72xf32>
    %cst_17 = arith.constant 5.000000e-01 : f32
    %31 = vector.broadcast %cst_17 : f32 to vector<8x72xf32>
    %32 = arith.mulf %30, %31 : vector<8x72xf32>
    %cst_18 = arith.constant 5.000000e-01 : f32
    %33 = vector.broadcast %cst_18 : f32 to vector<8x72xf32>
    %34 = arith.addf %32, %33 : vector<8x72xf32>
    %35 = vector.extract_strided_slice %34 {offsets = [0, 0], sizes = [8, 18], strides = [1, 1]} : vector<8x72xf32> to vector<8x18xf32>
    %36 = vector.extract_strided_slice %34 {offsets = [0, 18], sizes = [8, 18], strides = [1, 1]} : vector<8x72xf32> to vector<8x18xf32>
    %37 = vector.extract_strided_slice %30 {offsets = [0, 36], sizes = [8, 18], strides = [1, 1]} : vector<8x72xf32> to vector<8x18xf32>
    %38 = vector.extract_strided_slice %34 {offsets = [0, 54], sizes = [8, 18], strides = [1, 1]} : vector<8x72xf32> to vector<8x18xf32>
    %39 = arith.mulf %36, %26 : vector<8x18xf32>
    %40 = arith.mulf %35, %37 : vector<8x18xf32>
    %41 = arith.addf %39, %40 : vector<8x18xf32>
    %42 = math.tanh %41 : vector<8x18xf32>
    %43 = arith.mulf %38, %42 : vector<8x18xf32>
    %44 = vector.extract_strided_slice %24 {offsets = [8, 0], sizes = [8, 72], strides = [1, 1]} : vector<64x144xf32> to vector<8x72xf32>
    %cst_19 = arith.constant dense<0.000000e+00> : vector<8x72xf32>
    %45 = tpu.matmul %43, %0, %cst_19 {dimension_numbers = #tpu.dot_dimension_numbers<[1], [0], [0], [1], [0, 0, 1, 1], [], []>} : vector<8x18xf32>, vector<18x72xf32>, vector<8x72xf32> -> vector<8x72xf32>
    %46 = arith.addf %44, %45 : vector<8x72xf32>
    %47 = math.tanh %46 : vector<8x72xf32>
    %cst_20 = arith.constant 5.000000e-01 : f32
    %48 = vector.broadcast %cst_20 : f32 to vector<8x72xf32>
    %49 = arith.mulf %47, %48 : vector<8x72xf32>
    %cst_21 = arith.constant 5.000000e-01 : f32
    %50 = vector.broadcast %cst_21 : f32 to vector<8x72xf32>
    %51 = arith.addf %49, %50 : vector<8x72xf32>
    %52 = vector.extract_strided_slice %51 {offsets = [0, 0], sizes = [8, 18], strides = [1, 1]} : vector<8x72xf32> to vector<8x18xf32>
    %53 = vector.extract_strided_slice %51 {offsets = [0, 18], sizes = [8, 18], strides = [1, 1]} : vector<8x72xf32> to vector<8x18xf32>
    %54 = vector.extract_strided_slice %47 {offsets = [0, 36], sizes = [8, 18], strides = [1, 1]} : vector<8x72xf32> to vector<8x18xf32>
    %55 = vector.extract_strided_slice %51 {offsets = [0, 54], sizes = [8, 18], strides = [1, 1]} : vector<8x72xf32> to vector<8x18xf32>
    %56 = arith.mulf %53, %41 : vector<8x18xf32>
    %57 = arith.mulf %52, %54 : vector<8x18xf32>
    %58 = arith.addf %56, %57 : vector<8x18xf32>
    %59 = math.tanh %58 : vector<8x18xf32>
    %60 = arith.mulf %55, %59 : vector<8x18xf32>
    %61 = vector.extract_strided_slice %24 {offsets = [16, 0], sizes = [8, 72], strides = [1, 1]} : vector<64x144xf32> to vector<8x72xf32>
    %cst_22 = arith.constant dense<0.000000e+00> : vector<8x72xf32>
    %62 = tpu.matmul %60, %0, %cst_22 {dimension_numbers = #tpu.dot_dimension_numbers<[1], [0], [0], [1], [0, 0, 1, 1], [], []>} : vector<8x18xf32>, vector<18x72xf32>, vector<8x72xf32> -> vector<8x72xf32>
    %63 = arith.addf %61, %62 : vector<8x72xf32>
    %64 = math.tanh %63 : vector<8x72xf32>
    %cst_23 = arith.constant 5.000000e-01 : f32
    %65 = vector.broadcast %cst_23 : f32 to vector<8x72xf32>
    %66 = arith.mulf %64, %65 : vector<8x72xf32>
    %cst_24 = arith.constant 5.000000e-01 : f32
    %67 = vector.broadcast %cst_24 : f32 to vector<8x72xf32>
    %68 = arith.addf %66, %67 : vector<8x72xf32>
    %69 = vector.extract_strided_slice %68 {offsets = [0, 0], sizes = [8, 18], strides = [1, 1]} : vector<8x72xf32> to vector<8x18xf32>
    %70 = vector.extract_strided_slice %68 {offsets = [0, 18], sizes = [8, 18], strides = [1, 1]} : vector<8x72xf32> to vector<8x18xf32>
    %71 = vector.extract_strided_slice %64 {offsets = [0, 36], sizes = [8, 18], strides = [1, 1]} : vector<8x72xf32> to vector<8x18xf32>
    %72 = vector.extract_strided_slice %68 {offsets = [0, 54], sizes = [8, 18], strides = [1, 1]} : vector<8x72xf32> to vector<8x18xf32>
    %73 = arith.mulf %70, %58 : vector<8x18xf32>
    %74 = arith.mulf %69, %71 : vector<8x18xf32>
    %75 = arith.addf %73, %74 : vector<8x18xf32>
    %76 = math.tanh %75 : vector<8x18xf32>
    %77 = arith.mulf %72, %76 : vector<8x18xf32>
    %78 = vector.extract_strided_slice %24 {offsets = [24, 0], sizes = [8, 72], strides = [1, 1]} : vector<64x144xf32> to vector<8x72xf32>
    %cst_25 = arith.constant dense<0.000000e+00> : vector<8x72xf32>
    %79 = tpu.matmul %77, %0, %cst_25 {dimension_numbers = #tpu.dot_dimension_numbers<[1], [0], [0], [1], [0, 0, 1, 1], [], []>} : vector<8x18xf32>, vector<18x72xf32>, vector<8x72xf32> -> vector<8x72xf32>
    %80 = arith.addf %78, %79 : vector<8x72xf32>
    %81 = math.tanh %80 : vector<8x72xf32>
    %cst_26 = arith.constant 5.000000e-01 : f32
    %82 = vector.broadcast %cst_26 : f32 to vector<8x72xf32>
    %83 = arith.mulf %81, %82 : vector<8x72xf32>
    %cst_27 = arith.constant 5.000000e-01 : f32
    %84 = vector.broadcast %cst_27 : f32 to vector<8x72xf32>
    %85 = arith.addf %83, %84 : vector<8x72xf32>
    %86 = vector.extract_strided_slice %85 {offsets = [0, 0], sizes = [8, 18], strides = [1, 1]} : vector<8x72xf32> to vector<8x18xf32>
    %87 = vector.extract_strided_slice %85 {offsets = [0, 18], sizes = [8, 18], strides = [1, 1]} : vector<8x72xf32> to vector<8x18xf32>
    %88 = vector.extract_strided_slice %81 {offsets = [0, 36], sizes = [8, 18], strides = [1, 1]} : vector<8x72xf32> to vector<8x18xf32>
    %89 = vector.extract_strided_slice %85 {offsets = [0, 54], sizes = [8, 18], strides = [1, 1]} : vector<8x72xf32> to vector<8x18xf32>
    %90 = arith.mulf %87, %75 : vector<8x18xf32>
    %91 = arith.mulf %86, %88 : vector<8x18xf32>
    %92 = arith.addf %90, %91 : vector<8x18xf32>
    %93 = math.tanh %92 : vector<8x18xf32>
    %94 = arith.mulf %89, %93 : vector<8x18xf32>
    %95 = vector.extract_strided_slice %24 {offsets = [32, 0], sizes = [8, 72], strides = [1, 1]} : vector<64x144xf32> to vector<8x72xf32>
    %cst_28 = arith.constant dense<0.000000e+00> : vector<8x72xf32>
    %96 = tpu.matmul %94, %0, %cst_28 {dimension_numbers = #tpu.dot_dimension_numbers<[1], [0], [0], [1], [0, 0, 1, 1], [], []>} : vector<8x18xf32>, vector<18x72xf32>, vector<8x72xf32> -> vector<8x72xf32>
    %97 = arith.addf %95, %96 : vector<8x72xf32>
    %98 = math.tanh %97 : vector<8x72xf32>
    %cst_29 = arith.constant 5.000000e-01 : f32
    %99 = vector.broadcast %cst_29 : f32 to vector<8x72xf32>
    %100 = arith.mulf %98, %99 : vector<8x72xf32>
    %cst_30 = arith.constant 5.000000e-01 : f32
    %101 = vector.broadcast %cst_30 : f32 to vector<8x72xf32>
    %102 = arith.addf %100, %101 : vector<8x72xf32>
    %103 = vector.extract_strided_slice %102 {offsets = [0, 0], sizes = [8, 18], strides = [1, 1]} : vector<8x72xf32> to vector<8x18xf32>
    %104 = vector.extract_strided_slice %102 {offsets = [0, 18], sizes = [8, 18], strides = [1, 1]} : vector<8x72xf32> to vector<8x18xf32>
    %105 = vector.extract_strided_slice %98 {offsets = [0, 36], sizes = [8, 18], strides = [1, 1]} : vector<8x72xf32> to vector<8x18xf32>
    %106 = vector.extract_strided_slice %102 {offsets = [0, 54], sizes = [8, 18], strides = [1, 1]} : vector<8x72xf32> to vector<8x18xf32>
    %107 = arith.mulf %104, %92 : vector<8x18xf32>
    %108 = arith.mulf %103, %105 : vector<8x18xf32>
    %109 = arith.addf %107, %108 : vector<8x18xf32>
    %110 = math.tanh %109 : vector<8x18xf32>
    %111 = arith.mulf %106, %110 : vector<8x18xf32>
    %112 = vector.extract_strided_slice %24 {offsets = [40, 0], sizes = [8, 72], strides = [1, 1]} : vector<64x144xf32> to vector<8x72xf32>
    %cst_31 = arith.constant dense<0.000000e+00> : vector<8x72xf32>
    %113 = tpu.matmul %111, %0, %cst_31 {dimension_numbers = #tpu.dot_dimension_numbers<[1], [0], [0], [1], [0, 0, 1, 1], [], []>} : vector<8x18xf32>, vector<18x72xf32>, vector<8x72xf32> -> vector<8x72xf32>
    %114 = arith.addf %112, %113 : vector<8x72xf32>
    %115 = math.tanh %114 : vector<8x72xf32>
    %cst_32 = arith.constant 5.000000e-01 : f32
    %116 = vector.broadcast %cst_32 : f32 to vector<8x72xf32>
    %117 = arith.mulf %115, %116 : vector<8x72xf32>
    %cst_33 = arith.constant 5.000000e-01 : f32
    %118 = vector.broadcast %cst_33 : f32 to vector<8x72xf32>
    %119 = arith.addf %117, %118 : vector<8x72xf32>
    %120 = vector.extract_strided_slice %119 {offsets = [0, 0], sizes = [8, 18], strides = [1, 1]} : vector<8x72xf32> to vector<8x18xf32>
    %121 = vector.extract_strided_slice %119 {offsets = [0, 18], sizes = [8, 18], strides = [1, 1]} : vector<8x72xf32> to vector<8x18xf32>
    %122 = vector.extract_strided_slice %115 {offsets = [0, 36], sizes = [8, 18], strides = [1, 1]} : vector<8x72xf32> to vector<8x18xf32>
    %123 = vector.extract_strided_slice %119 {offsets = [0, 54], sizes = [8, 18], strides = [1, 1]} : vector<8x72xf32> to vector<8x18xf32>
    %124 = arith.mulf %121, %109 : vector<8x18xf32>
    %125 = arith.mulf %120, %122 : vector<8x18xf32>
    %126 = arith.addf %124, %125 : vector<8x18xf32>
    %127 = math.tanh %126 : vector<8x18xf32>
    %128 = arith.mulf %123, %127 : vector<8x18xf32>
    %129 = vector.extract_strided_slice %24 {offsets = [48, 0], sizes = [8, 72], strides = [1, 1]} : vector<64x144xf32> to vector<8x72xf32>
    %cst_34 = arith.constant dense<0.000000e+00> : vector<8x72xf32>
    %130 = tpu.matmul %128, %0, %cst_34 {dimension_numbers = #tpu.dot_dimension_numbers<[1], [0], [0], [1], [0, 0, 1, 1], [], []>} : vector<8x18xf32>, vector<18x72xf32>, vector<8x72xf32> -> vector<8x72xf32>
    %131 = arith.addf %129, %130 : vector<8x72xf32>
    %132 = math.tanh %131 : vector<8x72xf32>
    %cst_35 = arith.constant 5.000000e-01 : f32
    %133 = vector.broadcast %cst_35 : f32 to vector<8x72xf32>
    %134 = arith.mulf %132, %133 : vector<8x72xf32>
    %cst_36 = arith.constant 5.000000e-01 : f32
    %135 = vector.broadcast %cst_36 : f32 to vector<8x72xf32>
    %136 = arith.addf %134, %135 : vector<8x72xf32>
    %137 = vector.extract_strided_slice %136 {offsets = [0, 0], sizes = [8, 18], strides = [1, 1]} : vector<8x72xf32> to vector<8x18xf32>
    %138 = vector.extract_strided_slice %136 {offsets = [0, 18], sizes = [8, 18], strides = [1, 1]} : vector<8x72xf32> to vector<8x18xf32>
    %139 = vector.extract_strided_slice %132 {offsets = [0, 36], sizes = [8, 18], strides = [1, 1]} : vector<8x72xf32> to vector<8x18xf32>
    %140 = vector.extract_strided_slice %136 {offsets = [0, 54], sizes = [8, 18], strides = [1, 1]} : vector<8x72xf32> to vector<8x18xf32>
    %141 = arith.mulf %138, %126 : vector<8x18xf32>
    %142 = arith.mulf %137, %139 : vector<8x18xf32>
    %143 = arith.addf %141, %142 : vector<8x18xf32>
    %144 = math.tanh %143 : vector<8x18xf32>
    %145 = arith.mulf %140, %144 : vector<8x18xf32>
    %146 = vector.extract_strided_slice %24 {offsets = [56, 0], sizes = [8, 72], strides = [1, 1]} : vector<64x144xf32> to vector<8x72xf32>
    %cst_37 = arith.constant dense<0.000000e+00> : vector<8x72xf32>
    %147 = tpu.matmul %145, %0, %cst_37 {dimension_numbers = #tpu.dot_dimension_numbers<[1], [0], [0], [1], [0, 0, 1, 1], [], []>} : vector<8x18xf32>, vector<18x72xf32>, vector<8x72xf32> -> vector<8x72xf32>
    %148 = arith.addf %146, %147 : vector<8x72xf32>
    %149 = math.tanh %148 : vector<8x72xf32>
    %cst_38 = arith.constant 5.000000e-01 : f32
    %150 = vector.broadcast %cst_38 : f32 to vector<8x72xf32>
    %151 = arith.mulf %149, %150 : vector<8x72xf32>
    %cst_39 = arith.constant 5.000000e-01 : f32
    %152 = vector.broadcast %cst_39 : f32 to vector<8x72xf32>
    %153 = arith.addf %151, %152 : vector<8x72xf32>
    %154 = vector.extract_strided_slice %153 {offsets = [0, 0], sizes = [8, 18], strides = [1, 1]} : vector<8x72xf32> to vector<8x18xf32>
    %155 = vector.extract_strided_slice %153 {offsets = [0, 18], sizes = [8, 18], strides = [1, 1]} : vector<8x72xf32> to vector<8x18xf32>
    %156 = vector.extract_strided_slice %149 {offsets = [0, 36], sizes = [8, 18], strides = [1, 1]} : vector<8x72xf32> to vector<8x18xf32>
    %157 = vector.extract_strided_slice %153 {offsets = [0, 54], sizes = [8, 18], strides = [1, 1]} : vector<8x72xf32> to vector<8x18xf32>
    %158 = arith.mulf %155, %143 : vector<8x18xf32>
    %159 = arith.mulf %154, %156 : vector<8x18xf32>
    %160 = arith.addf %158, %159 : vector<8x18xf32>
    %161 = math.tanh %160 : vector<8x18xf32>
    %162 = arith.mulf %157, %161 : vector<8x18xf32>
    %163 = vector.extract_strided_slice %24 {offsets = [56, 72], sizes = [8, 72], strides = [1, 1]} : vector<64x144xf32> to vector<8x72xf32>
    %164 = math.tanh %163 : vector<8x72xf32>
    %cst_40 = arith.constant 5.000000e-01 : f32
    %165 = vector.broadcast %cst_40 : f32 to vector<8x72xf32>
    %166 = arith.mulf %164, %165 : vector<8x72xf32>
    %cst_41 = arith.constant 5.000000e-01 : f32
    %167 = vector.broadcast %cst_41 : f32 to vector<8x72xf32>
    %168 = arith.addf %166, %167 : vector<8x72xf32>
    %169 = vector.extract_strided_slice %168 {offsets = [0, 0], sizes = [8, 18], strides = [1, 1]} : vector<8x72xf32> to vector<8x18xf32>
    %170 = vector.extract_strided_slice %164 {offsets = [0, 36], sizes = [8, 18], strides = [1, 1]} : vector<8x72xf32> to vector<8x18xf32>
    %171 = vector.extract_strided_slice %168 {offsets = [0, 54], sizes = [8, 18], strides = [1, 1]} : vector<8x72xf32> to vector<8x18xf32>
    %172 = arith.mulf %169, %170 : vector<8x18xf32>
    %173 = math.tanh %172 : vector<8x18xf32>
    %174 = arith.mulf %171, %173 : vector<8x18xf32>
    %cst_42 = arith.constant dense<0.000000e+00> : vector<8x18xf32>
    %175 = tpu.matmul %162, %1, %cst_42 {dimension_numbers = #tpu.dot_dimension_numbers<[1], [0], [0], [1], [0, 0, 1, 1], [], []>} : vector<8x18xf32>, vector<18x18xf32>, vector<8x18xf32> -> vector<8x18xf32>
    %cst_43 = arith.constant dense<0.000000e+00> : vector<8x18xf32>
    %176 = tpu.matmul %174, %2, %cst_43 {dimension_numbers = #tpu.dot_dimension_numbers<[1], [0], [0], [1], [0, 0, 1, 1], [], []>} : vector<8x18xf32>, vector<18x18xf32>, vector<8x18xf32> -> vector<8x18xf32>
    %177 = arith.addf %175, %176 : vector<8x18xf32>
    %178 = vector.broadcast %3 : vector<1x18xf32> to vector<8x18xf32>
    %179 = arith.addf %177, %178 : vector<8x18xf32>
    %cst_44 = arith.constant 0.000000e+00 : f32
    %180 = vector.broadcast %cst_44 : f32 to vector<8x18xf32>
    %181 = arith.maximumf %179, %180 : vector<8x18xf32>
    %cst_45 = arith.constant dense<0.000000e+00> : vector<8x9xf32>
    %182 = tpu.matmul %181, %4, %cst_45 {dimension_numbers = #tpu.dot_dimension_numbers<[1], [0], [0], [1], [0, 0, 1, 1], [], []>} : vector<8x18xf32>, vector<18x9xf32>, vector<8x9xf32> -> vector<8x9xf32>
    %183 = vector.broadcast %5 : vector<1x9xf32> to vector<8x9xf32>
    %184 = arith.addf %182, %183 : vector<8x9xf32>
    %cst_46 = arith.constant 0.000000e+00 : f32
    %185 = vector.broadcast %cst_46 : f32 to vector<8x9xf32>
    %186 = arith.maximumf %184, %185 : vector<8x9xf32>
    %cst_47 = arith.constant dense<0.000000e+00> : vector<8x128xf32>
    %187 = tpu.matmul %186, %6, %cst_47 {dimension_numbers = #tpu.dot_dimension_numbers<[1], [0], [0], [1], [0, 0, 1, 1], [], []>} : vector<8x9xf32>, vector<9x128xf32>, vector<8x128xf32> -> vector<8x128xf32>
    %188 = vector.broadcast %7 : vector<1x128xf32> to vector<8x128xf32>
    %189 = arith.addf %187, %188 : vector<8x128xf32>
    %c0_48 = arith.constant 0 : index
    %c0_49 = arith.constant 0 : index
    %190 = vector.load %arg3[%c0_48, %c0_49] : memref<8x128xf32, #tpu.memory_space<vmem>>, vector<8x128xf32>
    tpu.vector_store %arg3[%c0_48, %c0_49], %189 {strides = array<i32>} : memref<8x128xf32, #tpu.memory_space<vmem>>, vector<8x128xf32>,
    return
  }
}

</mosaic_0001>

<bundles_post_ra>
// kernel: tpu_custom_call.1
= control target key start
LH: loop header
LB: loop body
LE: loop exit
PB: predicated region body
PF: predicated region fallthrough
CT: control target
= control target key end

     0   :  { %8 = vsyncpa [#allocation3], 0  ;;  %s2052_s0 = inlined_call_operand.hbm [shape: f32[2,112], index: 0, kind: input, shape index: {}]   ;;  %s2053_s1 = inlined_call_operand.hbm [shape: f32[24,144], index: 1, kind: input, shape index: {}]   ;;  %s2054_s2 = inlined_call_operand.hbm [shape: f32[136,128], index: 2, kind: input, shape index: {}]   ;;  %s2055_s3 = inlined_call_operand.hbm [shape: f32[8,128], index: 3, kind: output, shape index: {}]  }
   0x1   :  { %9 = vsyncpa [#allocation6], 0 }
   0x2   :  { %10 = vsyncpa [#allocation4], 0  ;;  %s1778_s12 = smov [#allocation5]   ;;  %s1684_s16 = scalar_lea.hbm %s2053_s1, 768 }
   0x3   :  { %s26_s13 = sshll.u32 %s1778_s12, 4  ;;  %p1685_p0 = scmp.ne.s32.totalorder %s2053_s1, %s1684_s16  ;;  %s27_s13 = int_to_ptr.vmem [resolvable:$true] %s26_s13 }
   0x4   :  { %p1688_p1 = scmp.lt.u32.totalorder %s1684_s16, %s2053_s1 }
   0x6   :  { %p1690_p2 = pnand %p1688_p1, %p1685_p0 }
   0x8   :  { %1693 = shalt.err (!%p1690_p2)
}
   0x9   :  { %s1694_s21 = scalar_lea.vmem %s27_s13, 768  ;;  %p1699_p4 = scmp.lt.s32.totalorder %s27_s13, %s27_s13 }
   0xa   :  { %p1695_p3 = scmp.ne.s32.totalorder %s27_s13, %s1694_s21  ;;  %p1700_p5 = scmp.lt.s32.totalorder %s1694_s21, %s1694_s21 }
   0xc   :  { %p1701_p6 = por %p1700_p5, %p1699_p4 }
   0xe   :  { %p1702_p7 = pnand %p1701_p6, %p1695_p3 }
  0x10   :  { %1705 = shalt.err (!%p1702_p7)
}
  0x11   :  { %s1779_s22 = smov 256   ;;  %s1780_s23 = smov 16  }
  0x12   :  { %32 = dma.hbm_to_vmem [thread:$0]  %s2053_s1, 768, %s27_s13, [#allocation6], %s1779_s22, %s1779_s22, %s1780_s23  }
  0x13   :  { %s1781_s26 = smov [#allocation2]   ;;  %s1782_s28 = smov [#allocation7]  }
  0x14   :  { %s17_s27 = sshll.u32 %s1781_s26, 4  ;;  %s38_s29 = sshll.u32 %s1782_s28, 4  ;;  %s18_s27 = int_to_ptr.vmem [resolvable:$true] %s17_s27  ;;  %s39_s29 = int_to_ptr.vmem [resolvable:$true] %s38_s29 }
  0x15   :  { %s1706_s5 = scalar_lea.hbm %s2052_s0, 32 }
  0x16   :  { %p1707_p8 = scmp.ne.s32.totalorder %s2052_s0, %s1706_s5  ;;  %p1710_p9 = scmp.lt.u32.totalorder %s1706_s5, %s2052_s0 }
  0x18   :  { %p1712_p10 = pnand %p1710_p9, %p1707_p8 }
  0x1a   :  { %1715 = shalt.err (!%p1712_p10)
}
  0x1b   :  { %s1716_s1 = scalar_lea.vmem %s18_s27, 32  ;;  %p1721_p12 = scmp.lt.s32.totalorder %s18_s27, %s18_s27 }
  0x1c   :  { %p1717_p11 = scmp.ne.s32.totalorder %s18_s27, %s1716_s1  ;;  %p1722_p13 = scmp.lt.s32.totalorder %s1716_s1, %s1716_s1 }
  0x1e   :  { %p1723_p0 = por %p1722_p13, %p1721_p12 }
  0x20   :  { %p1724_p1 = pnand %p1723_p0, %p1717_p11 }
  0x22   :  { %1727 = shalt.err (!%p1724_p1)
}
  0x23   :  { %20 = dma.hbm_to_vmem [thread:$0]  %s2052_s0, 32, %s18_s27, [#allocation3]  }
  0x24   :  { %s1728_s14 = scalar_lea.hbm %s2054_s2, 2176 }
  0x25   :  { %p1729_p2 = scmp.ne.s32.totalorder %s2054_s2, %s1728_s14  ;;  %p1732_p3 = scmp.lt.u32.totalorder %s1728_s14, %s2054_s2 }
  0x27   :  { %p1734_p4 = pnand %p1732_p3, %p1729_p2 }
  0x29   :  { %1737 = shalt.err (!%p1734_p4)
}
  0x2a   :  { %s1738_s19 = scalar_lea.vmem %s39_s29, 2176  ;;  %p1743_p6 = scmp.lt.s32.totalorder %s39_s29, %s39_s29 }
  0x2b   :  { %p1739_p5 = scmp.ne.s32.totalorder %s39_s29, %s1738_s19  ;;  %p1744_p7 = scmp.lt.s32.totalorder %s1738_s19, %s1738_s19 }
  0x2d   :  { %p1745_p8 = por %p1744_p7, %p1743_p6 }
  0x2f   :  { %p1746_p9 = pnand %p1745_p8, %p1739_p5 }
  0x31   :  { %1749 = shalt.err (!%p1746_p9)
}
  0x32   :  { %s1783_s0 = smov 128   ;;  %s1784_s20 = smov 8  }
  0x33   :  { %44 = dma.hbm_to_vmem [thread:$0]  %s2054_s2, 2176, %s39_s29, [#allocation6], %s1783_s0, %s1783_s0, %s1784_s20  }
  0x34   :  { %1772 = dma.done.wait [#allocation3], 32  }
  0x35   :  { %1773 = vsyncadd [#allocation3], 4294967264 }
  0x36   :  { %1774 = dma.done.wait [#allocation6], 2944  }
  0x37   :  { %1775 = vsyncadd [#allocation6], 4294964352  ;;  %v1785_v0 = vmov 0.0   ;;  %vm123_vm0 = vcmask 1045504   ;;  %vm78_vm1 = vcmask 1041408   ;;  %vm1786_vm2 = vmmov 1  }
  0x38   :  { %194 = vmatprep.mubr.f32.mxu0 %v1785_v0  ;;  %204 = vmatprep.mubr.f32.mxu1 %v1785_v0  ;;  %vm1862_vm3 = vmpackc.low %vm123_vm0, %vm1786_vm2  ;;  %v77_v2 = vld [vmem:[#allocation2] sm:$0x3]  ;;  %v72_v3 = vld [vmem:[#allocation5 + $0x8] sm:$0xff]  ;;  %s1787_s2 = smov 114   ;;  %vm106_vm4 = vcmask 113664   ;;  %v1788_v13 = vmov 0.0|0.0   ;;  %v96_v16 = vlaneseq }
  0x39   :  { %v74_v4 = vld [vmem:[#allocation5 + $0x18] sm:$0x3f]  ;;  %v1867_v5 = vsel %vm78_vm1, %v77_v2, 0.0  ;;  %v71_v7 = vld [vmem:[#allocation5] sm:$0xff]  ;;  %v73_v8 = vld [vmem:[#allocation5 + $0x10] sm:$0x3f] }
  0x3a   :  { %v1560_v6 = vpack.c.bf16 %v74_v4, %v72_v3  ;;  %v54_v9 = vld [vmem:[#allocation7] sm:$0xff]  ;;  %81 = vrot.lane.b32.xlu0 %v1867_v5, %s1787_s2  ;;  %v1563_v10 = vpack.c.bf16 %v73_v8, %v71_v7  ;;  %v55_v11 = vld [vmem:[#allocation7 + $0x8] sm:$0xff]  ;;  %v1887_v14 = vld [vmem:[#allocation7 + $0x10] sm:$0x3]  ;;  %vm1789_vm5 = vmmov 0   ;;  %v1903_v17 = vshrl.u32 %v96_v16, 7 }
  0x3b   :  { %v1876_v12 = vpack.c.bf16 %v55_v11, %v54_v9  ;;  %v1906_v19 = vld [vmem:[#allocation5 + $0x20] ss:$8 sm:$0x3]  ;;  %s1790_s23 = smov 92   ;;  %s1791_s24 = smov 18   ;;  %vm236_vm6 = vcmask 146432  }
  0x3c   :  { %1562 = vmatprep.subr.msk.bf16.mxu0 %vm1862_vm3, %v1560_v6  ;;  %1603 = vmatprep.subr.msk.bf16.mxu1 %vm1862_vm3, %v1560_v6  ;;  %v98_v18 = vsub.s32 0, %v1903_v17  ;;  %s1792_s25 = smov 36   ;;  %s1793_s26 = smov 74   ;;  %vm1030_vm7 = vcmask 15360   ;;  %vm1280_vm8 = vcmask 1040384   ;;  %vm1276_vm10 = vcmask 72704  }
  0x3d   :  { %1565 = vmatpush1.bf16.msk.msra.mxu0 %vm1862_vm3, %v1563_v10  ;;  %1604 = vmatpush1.bf16.msk.msra.mxu1 %vm1862_vm3, %v1563_v10  ;;  %s1794_s27 = smov 100   ;;  %s1795_s28 = smov 86   ;;  %vm1601_vm9 = vmpackc.low %vm1280_vm8, %vm1786_vm2 }
  0x3e   :  { %1566 = vmatprep.subr.bf16.mxu0 %v1788_v13  ;;  %1587 = vmatprep.subr.bf16.mxu1 %v1788_v13  ;;  %v1909_v20 = vrot.slane %v1906_v19, %v98_v18  ;;  %s1796_s29 = smov 72   ;;  %s1797_s30 = smov 58  }
  0x3f   :  { %s1798_s4 = smov 44   ;;  %s1799_s5 = smov 30  }
  0x40   :  { %1373 = vmatmul.mubr.msk.f32.vlgmr.msra.gmra.mrb[0].mxu0 %vm106_vm4, %v1867_v5  ;;  %s1800_s6 = smov 54   ;;  %s1801_s7 = smov 2  }
  0x41   :  { %1568 = vmatpush3.bf16.msra.mxu0 %v1876_v12  ;;  %199 = vmatprep.mubr.f32.mxu0 %v1785_v0  ;;  %s1802_s8 = smov [#allocation8]  }
  0x42   :  { %1458 = vmatprep.subr.mxu0 %v1785_v0  ;;  %s1361_s9 = sshll.u32 %s1802_s8, 4  ;;  %s1362_s9 = int_to_ptr.vmem [resolvable:$true] %s1361_s9 }
  0x43   :  { %s1750_s1 = scalar_lea.vmem %s1362_s9, 128  ;;  %p1755_p11 = scmp.lt.s32.totalorder %s1362_s9, %s1362_s9 }
  0x44   :  { %p1751_p10 = scmp.ne.s32.totalorder %s1362_s9, %s1750_s1  ;;  %p1756_p12 = scmp.lt.s32.totalorder %s1750_s1, %s1750_s1 }
  0x45   :  { %1459 = vmatpush3.msk.msra.mxu0 %vm78_vm1, %v1887_v14 }
  0x46   :  { %1569 = vmatprep.subr.bf16.mxu0 %v1788_v13  ;;  %p1757_p13 = por %p1756_p12, %p1755_p11 }
  0x48   :  { %p1758_p0 = pnand %p1757_p13, %p1751_p10 }
  0xac   :  { %v82_v15 = vpop.permute.xlu0 %81 }
  0xad   :  { %1374 = vmatmul.mubr.msk.f32.gmra.mrb[2].mxu0 %vm106_vm4, %v82_v15 }
  0xae   :  { %1460 = vmatprep.mubr.msk.f32.mxu0 %vm1789_vm5, %v1785_v0 }
  0xb1   :  { %1461 = vmatmul.mubr.f32.vlgmr.msra.gmra.mrb[0].mxu0 %v1785_v0 }
  0xb2   :  { %1571 = vmatpush3.bf16.msra.mxu0 %v1876_v12  ;;  %1469 = vmatprep.mubr.msk.f32.mxu0 %vm1789_vm5, %v1785_v0 }
  0xb3   :  { %1467 = vmatprep.subr.mxu0 %v1785_v0 }
  0xb6   :  { %1468 = vmatpush3.msk.msra.mxu0 %vm78_vm1, %v1887_v14 }
  0xb7   :  { %1572 = vmatprep.subr.bf16.mxu0 %v1788_v13 }
 0x184   :  { %v309_v21 = vpop.f32.mrb[0].mxu0 }
 0x185   :  { %v1605_v22 = vadd.f32 %v309_v21, %v1909_v20  ;;  %v1462_v23 = vpop.f32.mrb[1].mxu0 }
 0x187   :  { %1646 = vtanh.f32 %v1605_v22 }
 0x191   :  { %v1647_v24 = vpop.eup %1646 }
 0x192   :  { %319 = vrot.lane.b32.xlu0 %v1647_v24, %s1790_s23  ;;  %v315_v25 = vmul.f32 0.5, %v1647_v24 }
 0x194   :  { %v316_v26 = vadd.f32 0.5, %v315_v25 }
 0x196   :  { %v317_v29 = vmul.f32 0.0, %v316_v26 }
 0x204   :  { %v320_v27 = vpop.permute.xlu0 %319 }
 0x205   :  { %v322_v28 = vmul.f32 %v320_v27, %v316_v26 }
 0x207   :  { %324 = vrot.lane.b32.xlu1 %v322_v28, %s1791_s24 }
 0x279   :  { %v325_v30 = vpop.permute.xlu1 %324 }
 0x27a   :  { %v327_v31 = vadd.f32 %v325_v30, %v317_v29 }
 0x27c   :  { %1648 = vtanh.f32 %v327_v31 }
 0x286   :  { %v1649_v32 = vpop.eup %1648 }
 0x287   :  { %330 = vrot.lane.b32.xlu1 %v1649_v32, %s1792_s25 }
 0x2f9   :  { %v331_v33 = vpop.permute.xlu1 %330 }
 0x2fa   :  { %v333_v34 = vmul.f32 %v331_v33, %v316_v26 }
 0x2fc   :  { %335 = vrot.lane.b32.xlu0 %v333_v34, %s1793_s26 }
 0x36e   :  { %v336_v35 = vpop.permute.xlu0 %335 }
 0x36f   :  { %1470 = vmatmul.mubr.msk.f32.vlgmr.msra.gmra.mrb[2].mxu0 %vm236_vm6, %v336_v35 }
 0x370   :  { %1574 = vmatpush3.bf16.msra.mxu0 %v1876_v12  ;;  %1478 = vmatprep.mubr.msk.f32.mxu0 %vm1789_vm5, %v1785_v0 }
 0x371   :  { %1476 = vmatprep.subr.mxu0 %v1785_v0 }
 0x374   :  { %1477 = vmatpush3.msk.msra.mxu0 %vm78_vm1, %v1887_v14 }
 0x375   :  { %1575 = vmatprep.subr.bf16.mxu0 %v1788_v13 }
 0x442   :  { %v405_v36 = vpop.f32.mrb[2].mxu0 }
 0x443   :  { %v1606_v37 = vadd.f32 %v405_v36, %v1909_v20  ;;  %v1471_v38 = vpop.f32.mrb[3].mxu0 }
 0x445   :  { %1650 = vtanh.f32 %v1606_v37 }
 0x44f   :  { %v1651_v39 = vpop.eup %1650 }
 0x450   :  { %415 = vrot.lane.b32.xlu1 %v1651_v39, %s1790_s23  ;;  %v411_v40 = vmul.f32 0.5, %v1651_v39 }
 0x452   :  { %v412_v41 = vadd.f32 0.5, %v411_v40 }
 0x454   :  { %v413_v44 = vmul.f32 %v412_v41, %v327_v31 }
 0x4c2   :  { %v416_v42 = vpop.permute.xlu1 %415 }
 0x4c3   :  { %v418_v43 = vmul.f32 %v416_v42, %v412_v41 }
 0x4c5   :  { %420 = vrot.lane.b32.xlu0 %v418_v43, %s1791_s24 }
 0x4c9   :  { %83 = vrot.lane.b32.xlu0 %v1867_v5, %s1794_s27 }
 0x537   :  { %v421_v45 = vpop.permute.xlu0 %420 }
 0x538   :  { %v423_v46 = vadd.f32 %v421_v45, %v413_v44 }
 0x53a   :  { %1652 = vtanh.f32 %v423_v46 }
 0x53b   :  { %v84_v47 = vpop.permute.xlu0 %83 }
 0x53c   :  { %1375 = vmatmul.mubr.msk.f32.vlgmr.msra.gmra.mrb[0].mxu1 %vm106_vm4, %v84_v47 }
 0x53d   :  { %209 = vmatprep.mubr.f32.mxu1 %v1785_v0  ;;  %1589 = vmatpush3.bf16.msra.mxu1 %v1876_v12 }
 0x53e   :  { %1521 = vmatprep.subr.mxu1 %v1785_v0 }
 0x541   :  { %1522 = vmatpush3.msk.msra.mxu1 %vm78_vm1, %v1887_v14 }
 0x542   :  { %1590 = vmatprep.subr.bf16.mxu1 %v1788_v13 }
 0x544   :  { %v1653_v48 = vpop.eup %1652 }
 0x545   :  { %426 = vrot.lane.b32.xlu1 %v1653_v48, %s1792_s25 }
 0x5b7   :  { %v427_v49 = vpop.permute.xlu1 %426 }
 0x5b8   :  { %v429_v50 = vmul.f32 %v427_v49, %v412_v41 }
 0x5ba   :  { %431 = vrot.lane.b32.xlu1 %v429_v50, %s1793_s26 }
 0x60f   :  { %v206_v51 = vpop.f32.mrb[0].mxu1 }
 0x610   :  { %v208_v52 = vpop.f32.mrb[1].mxu1  ;;  %v207_v54 = vadd.f32 %v206_v51, %v1909_v20 }
 0x62c   :  { %v432_v53 = vpop.permute.xlu1 %431 }
 0x62d   :  { %1479 = vmatmul.mubr.msk.f32.vlgmr.msra.gmra.mrb[4].mxu0 %vm236_vm6, %v432_v53 }
 0x62e   :  { %1577 = vmatpush3.bf16.msra.mxu0 %v1876_v12  ;;  %1487 = vmatprep.mubr.msk.f32.mxu0 %vm1789_vm5, %v1785_v0 }
 0x62f   :  { %1485 = vmatprep.subr.mxu0 %v1785_v0 }
 0x632   :  { %1486 = vmatpush3.msk.msra.mxu0 %vm78_vm1, %v1887_v14 }
 0x633   :  { %1578 = vmatprep.subr.bf16.mxu0 %v1788_v13 }
 0x700   :  { %v501_v55 = vpop.f32.mrb[4].mxu0 }
 0x701   :  { %v505_v56 = vadd.f32 %v501_v55, %v207_v54  ;;  %v1480_v57 = vpop.f32.mrb[5].mxu0 }
 0x703   :  { %1654 = vtanh.f32 %v505_v56 }
 0x70d   :  { %v1655_v58 = vpop.eup %1654 }
 0x70e   :  { %511 = vrot.lane.b32.xlu0 %v1655_v58, %s1790_s23  ;;  %v507_v59 = vmul.f32 0.5, %v1655_v58 }
 0x710   :  { %v508_v60 = vadd.f32 0.5, %v507_v59 }
 0x712   :  { %v509_v63 = vmul.f32 %v508_v60, %v423_v46 }
 0x780   :  { %v512_v61 = vpop.permute.xlu0 %511 }
 0x781   :  { %v514_v62 = vmul.f32 %v512_v61, %v508_v60 }
 0x783   :  { %516 = vrot.lane.b32.xlu1 %v514_v62, %s1791_s24 }
 0x787   :  { %85 = vrot.lane.b32.xlu1 %v1867_v5, %s1795_s28 }
 0x7f5   :  { %v517_v1 = vpop.permute.xlu1 %516 }
 0x7f6   :  { %v519_v2 = vadd.f32 %v517_v1, %v509_v63 }
 0x7f8   :  { %1656 = vtanh.f32 %v519_v2 }
 0x7f9   :  { %v86_v3 = vpop.permute.xlu1 %85 }
 0x7fa   :  { %1376 = vmatmul.mubr.msk.f32.gmra.mrb[2].mxu1 %vm106_vm4, %v86_v3 }
 0x7fb   :  { %214 = vmatprep.mubr.f32.mxu1 %v1785_v0 }
 0x802   :  { %v1657_v4 = vpop.eup %1656 }
 0x803   :  { %522 = vrot.lane.b32.xlu0 %v1657_v4, %s1792_s25 }
 0x875   :  { %v523_v6 = vpop.permute.xlu0 %522 }
 0x876   :  { %v525_v7 = vmul.f32 %v523_v6, %v508_v60 }
 0x878   :  { %527 = vrot.lane.b32.xlu0 %v525_v7, %s1793_s26 }
 0x8cd   :  { %v211_v8 = vpop.f32.mrb[2].mxu1 }
 0x8ce   :  { %v213_v9 = vpop.f32.mrb[3].mxu1  ;;  %v212_v11 = vadd.f32 %v211_v8, %v1909_v20 }
 0x8ea   :  { %v528_v10 = vpop.permute.xlu0 %527 }
 0x8eb   :  { %1488 = vmatmul.mubr.msk.f32.vlgmr.msra.gmra.mrb[6].mxu0 %vm236_vm6, %v528_v10 }
 0x8ec   :  { %1580 = vmatpush3.bf16.msra.mxu0 %v1876_v12  ;;  %1496 = vmatprep.mubr.msk.f32.mxu0 %vm1789_vm5, %v1785_v0 }
 0x8ed   :  { %1494 = vmatprep.subr.mxu0 %v1785_v0 }
 0x8f0   :  { %1495 = vmatpush3.msk.msra.mxu0 %vm78_vm1, %v1887_v14 }
 0x8f1   :  { %1581 = vmatprep.subr.bf16.mxu0 %v1788_v13 }
 0x9be   :  { %v597_v15 = vpop.f32.mrb[6].mxu0 }
 0x9bf   :  { %v601_v16 = vadd.f32 %v597_v15, %v212_v11  ;;  %v1489_v18 = vpop.f32.mrb[7].mxu0 }
 0x9c1   :  { %1658 = vtanh.f32 %v601_v16 }
 0x9cb   :  { %v1659_v21 = vpop.eup %1658 }
 0x9cc   :  { %607 = vrot.lane.b32.xlu1 %v1659_v21, %s1790_s23  ;;  %v603_v22 = vmul.f32 0.5, %v1659_v21 }
 0x9ce   :  { %v604_v23 = vadd.f32 0.5, %v603_v22 }
 0x9d0   :  { %v605_v26 = vmul.f32 %v604_v23, %v519_v2 }
 0xa3e   :  { %v608_v24 = vpop.permute.xlu1 %607 }
 0xa3f   :  { %v610_v25 = vmul.f32 %v608_v24, %v604_v23 }
 0xa41   :  { %612 = vrot.lane.b32.xlu0 %v610_v25, %s1791_s24 }
 0xa45   :  { %87 = vrot.lane.b32.xlu0 %v1867_v5, %s1796_s29 }
 0xab3   :  { %v613_v27 = vpop.permute.xlu0 %612 }
 0xab4   :  { %v615_v28 = vadd.f32 %v613_v27, %v605_v26 }
 0xab6   :  { %1660 = vtanh.f32 %v615_v28 }
 0xab7   :  { %v88_v29 = vpop.permute.xlu0 %87 }
 0xab8   :  { %1377 = vmatmul.mubr.msk.f32.gmra.mrb[4].mxu1 %vm106_vm4, %v88_v29 }
 0xab9   :  { %219 = vmatprep.mubr.f32.mxu1 %v1785_v0 }
 0xac0   :  { %v1661_v30 = vpop.eup %1660 }
 0xac1   :  { %618 = vrot.lane.b32.xlu1 %v1661_v30, %s1792_s25 }
 0xb33   :  { %v619_v31 = vpop.permute.xlu1 %618 }
 0xb34   :  { %v621_v32 = vmul.f32 %v619_v31, %v604_v23 }
 0xb36   :  { %623 = vrot.lane.b32.xlu1 %v621_v32, %s1793_s26 }
 0xb8b   :  { %v216_v33 = vpop.f32.mrb[4].mxu1 }
 0xb8c   :  { %v218_v34 = vpop.f32.mrb[5].mxu1  ;;  %v217_v36 = vadd.f32 %v216_v33, %v1909_v20 }
 0xba8   :  { %v624_v35 = vpop.permute.xlu1 %623 }
 0xba9   :  { %1497 = vmatmul.mubr.msk.f32.vlgmr.msra.gmra.mrb[8].mxu0 %vm236_vm6, %v624_v35 }
 0xbaa   :  { %1583 = vmatpush3.bf16.msra.mxu0 %v1876_v12  ;;  %1505 = vmatprep.mubr.msk.f32.mxu0 %vm1789_vm5, %v1785_v0 }
 0xbab   :  { %1503 = vmatprep.subr.mxu0 %v1785_v0 }
 0xbae   :  { %1504 = vmatpush3.msk.msra.mxu0 %vm78_vm1, %v1887_v14 }
 0xbaf   :  { %1584 = vmatprep.subr.bf16.mxu0 %v1788_v13 }
 0xc7c   :  { %v693_v37 = vpop.f32.mrb[8].mxu0 }
 0xc7d   :  { %v697_v38 = vadd.f32 %v693_v37, %v217_v36  ;;  %v1498_v39 = vpop.f32.mrb[9].mxu0 }
 0xc7f   :  { %1662 = vtanh.f32 %v697_v38 }
 0xc89   :  { %v1663_v40 = vpop.eup %1662 }
 0xc8a   :  { %703 = vrot.lane.b32.xlu0 %v1663_v40, %s1790_s23  ;;  %v699_v41 = vmul.f32 0.5, %v1663_v40 }
 0xc8c   :  { %v700_v42 = vadd.f32 0.5, %v699_v41 }
 0xc8e   :  { %v701_v45 = vmul.f32 %v700_v42, %v615_v28 }
 0xcfc   :  { %v704_v43 = vpop.permute.xlu0 %703 }
 0xcfd   :  { %v706_v44 = vmul.f32 %v704_v43, %v700_v42 }
 0xcff   :  { %708 = vrot.lane.b32.xlu1 %v706_v44, %s1791_s24 }
 0xd03   :  { %89 = vrot.lane.b32.xlu1 %v1867_v5, %s1797_s30 }
 0xd71   :  { %v709_v46 = vpop.permute.xlu1 %708 }
 0xd72   :  { %v711_v47 = vadd.f32 %v709_v46, %v701_v45 }
 0xd74   :  { %1664 = vtanh.f32 %v711_v47 }
 0xd75   :  { %v90_v48 = vpop.permute.xlu1 %89 }
 0xd76   :  { %1378 = vmatmul.mubr.msk.f32.gmra.mrb[6].mxu1 %vm106_vm4, %v90_v48 }
 0xd77   :  { %224 = vmatprep.mubr.f32.mxu1 %v1785_v0 }
 0xd7e   :  { %v1665_v49 = vpop.eup %1664 }
 0xd7f   :  { %714 = vrot.lane.b32.xlu0 %v1665_v49, %s1792_s25 }
 0xdf1   :  { %v715_v50 = vpop.permute.xlu0 %714 }
 0xdf2   :  { %v717_v51 = vmul.f32 %v715_v50, %v700_v42  ;;  %v102_v50 = vsub.s32 1, %v1903_v17 }
 0xdf4   :  { %719 = vrot.lane.b32.xlu0 %v717_v51, %s1793_s26  ;;  %v103_v51 = vrot.slane %v1906_v19, %v102_v50 }
 0xe49   :  { %v221_v52 = vpop.f32.mrb[6].mxu1 }
 0xe4a   :  { %v223_v53 = vpop.f32.mrb[7].mxu1  ;;  %v222_v55 = vadd.f32 %v221_v52, %v1909_v20 }
 0xe4b   :  { %v60_v53 = vld [vmem:[#allocation7 + $0x30] sm:$0xff] }
 0xe66   :  { %v720_v54 = vpop.permute.xlu0 %719 }
 0xe67   :  { %1506 = vmatmul.mubr.msk.f32.vlgmr.msra.gmra.mrb[10].mxu0 %vm236_vm6, %v720_v54  ;;  %v61_v54 = vld [vmem:[#allocation7 + $0x38] sm:$0xff] }
 0xe68   :  { %1586 = vmatpush3.bf16.msra.mxu0 %v1876_v12  ;;  %1514 = vmatprep.mubr.msk.f32.mxu0 %vm1789_vm5, %v1785_v0 }
 0xe69   :  { %1512 = vmatprep.subr.mxu0 %v1785_v0 }
 0xe6c   :  { %1513 = vmatpush3.msk.msra.mxu0 %vm78_vm1, %v1887_v14 }
 0xf3a   :  { %v789_v56 = vpop.f32.mrb[10].mxu0 }
 0xf3b   :  { %v793_v57 = vadd.f32 %v789_v56, %v222_v55  ;;  %v1507_v58 = vpop.f32.mrb[11].mxu0  ;;  %v1591_v56 = vpack.c.bf16 %v61_v54, %v60_v53 }
 0xf3d   :  { %1666 = vtanh.f32 %v793_v57 }
 0xf47   :  { %v1667_v59 = vpop.eup %1666 }
 0xf48   :  { %799 = vrot.lane.b32.xlu1 %v1667_v59, %s1790_s23  ;;  %v795_v60 = vmul.f32 0.5, %v1667_v59  ;;  %v62_v59 = vld [vmem:[#allocation7 + $0x40] sm:$0x3] }
 0xf4a   :  { %v796_v61 = vadd.f32 0.5, %v795_v60 }
 0xf4c   :  { %v797_v63 = vmul.f32 %v796_v61, %v711_v47 }
 0xfba   :  { %v800_v12 = vpop.permute.xlu1 %799 }
 0xfbb   :  { %v802_v62 = vmul.f32 %v800_v12, %v796_v61 }
 0xfbd   :  { %804 = vrot.lane.b32.xlu0 %v802_v62, %s1791_s24 }
 0xfc1   :  { %91 = vrot.lane.b32.xlu0 %v1867_v5, %s1798_s4 }
0x102f   :  { %v805_v14 = vpop.permute.xlu0 %804 }
0x1030   :  { %v807_v1 = vadd.f32 %v805_v14, %v797_v63  ;;  %v57_v63 = vld [vmem:[#allocation7 + $0x18] sm:$0xff]  ;;  %v58_v14 = vld [vmem:[#allocation7 + $0x20] sm:$0xff] }
0x1032   :  { %1668 = vtanh.f32 %v807_v1 }
0x1033   :  { %v92_v2 = vpop.permute.xlu0 %91 }
0x1034   :  { %1379 = vmatmul.mubr.msk.f32.gmra.mrb[8].mxu1 %vm106_vm4, %v92_v2  ;;  %v1594_v2 = vpack.c.bf16 %v58_v14, %v57_v63 }
0x1035   :  { %229 = vmatprep.mubr.f32.mxu1 %v1785_v0 }
0x103c   :  { %v1669_v3 = vpop.eup %1668 }
0x103d   :  { %810 = vrot.lane.b32.xlu1 %v1669_v3, %s1792_s25 }
0x10af   :  { %v811_v4 = vpop.permute.xlu1 %810 }
0x10b0   :  { %v813_v6 = vmul.f32 %v811_v4, %v796_v61 }
0x10b2   :  { %815 = vrot.lane.b32.xlu1 %v813_v6, %s1793_s26 }
0x1107   :  { %v226_v7 = vpop.f32.mrb[8].mxu1 }
0x1108   :  { %v228_v8 = vpop.f32.mrb[9].mxu1  ;;  %v227_v10 = vadd.f32 %v226_v7, %v1909_v20  ;;  %v59_v7 = vld [vmem:[#allocation7 + $0x28] sm:$0x3] }
0x1124   :  { %v816_v9 = vpop.permute.xlu1 %815 }
0x1125   :  { %1515 = vmatmul.mubr.msk.f32.vlgmr.msra.gmra.mrb[12].mxu0 %vm236_vm6, %v816_v9  ;;  %v64_v9 = vld [vmem:[#allocation7 + $0x50] sm:$0xff] }
0x11f8   :  { %v885_v11 = vpop.f32.mrb[12].mxu0 }
0x11f9   :  { %v889_v15 = vadd.f32 %v885_v11, %v227_v10  ;;  %v1516_v16 = vpop.f32.mrb[13].mxu0  ;;  %v65_v10 = vld [vmem:[#allocation7 + $0x58] sm:$0xff] }
0x11fa   :  { %v1597_v11 = vpack.c.bf16 %v65_v10, %v64_v9 }
0x11fb   :  { %1670 = vtanh.f32 %v889_v15  ;;  %v66_v15 = vld [vmem:[#allocation7 + $0x60] sm:$0x3] }
0x1205   :  { %v1671_v18 = vpop.eup %1670 }
0x1206   :  { %895 = vrot.lane.b32.xlu0 %v1671_v18, %s1790_s23  ;;  %v891_v21 = vmul.f32 0.5, %v1671_v18 }
0x1208   :  { %v892_v22 = vadd.f32 0.5, %v891_v21  ;;  %v1400_v21 = vld [vmem:[#allocation7 + $0x48] ss:$0 sm:$0xff] }
0x120a   :  { %v893_v25 = vmul.f32 %v892_v22, %v807_v1 }
0x1278   :  { %v896_v23 = vpop.permute.xlu0 %895 }
0x1279   :  { %v898_v24 = vmul.f32 %v896_v23, %v892_v22 }
0x127b   :  { %900 = vrot.lane.b32.xlu1 %v898_v24, %s1791_s24 }
0x127f   :  { %93 = vrot.lane.b32.xlu1 %v1867_v5, %s1799_s5 }
0x12ed   :  { %v901_v26 = vpop.permute.xlu1 %900 }
0x12ee   :  { %v903_v27 = vadd.f32 %v901_v26, %v893_v25 }
0x12f0   :  { %1672 = vtanh.f32 %v903_v27 }
0x12f1   :  { %v94_v28 = vpop.permute.xlu1 %93 }
0x12f2   :  { %1380 = vmatmul.mubr.msk.f32.gmra.mrb[10].mxu1 %vm106_vm4, %v94_v28  ;;  %v69_v28 = vld [vmem:[#allocation7 + $0x78] sm:$0x1] }
0x12f3   :  { %1523 = vmatprep.mubr.msk.f32.mxu1 %vm1789_vm5, %v1785_v0 }
0x12fa   :  { %v1673_v29 = vpop.eup %1672 }
0x12fb   :  { %906 = vrot.lane.b32.xlu0 %v1673_v29, %s1792_s25 }
0x136d   :  { %v907_v30 = vpop.permute.xlu0 %906 }
0x136e   :  { %v909_v31 = vmul.f32 %v907_v30, %v892_v22 }
0x1370   :  { %911 = vrot.lane.b32.xlu0 %v909_v31, %s1793_s26 }
0x13c5   :  { %v231_v32 = vpop.f32.mrb[10].mxu1 }
0x13c6   :  { %v232_v5 = vadd.f32 %v231_v32, %v1909_v20  ;;  %v233_v34 = vpop.f32.mrb[11].mxu1 }
0x13c7   :  { %v234_v52 = vadd.f32 %v233_v34, %v103_v51 }
0x13c8   :  { %1674 = vtanh.f32 %v232_v5 }
0x13d2   :  { %v1675_v33 = vpop.eup %1674 }
0x13d3   :  { %1013 = vrot.lane.b32.xlu0 %v1675_v33, %s1790_s23  ;;  %v1008_v36 = vmul.f32 0.5, %v1675_v33  ;;  %v1404_v33 = vld [vmem:[#allocation7 + $0x80] ss:$0 sm:$0xff] }
0x13d5   :  { %v1010_v37 = vadd.f32 0.5, %v1008_v36 }
0x13e2   :  { %v912_v35 = vpop.permute.xlu0 %911 }
0x13e3   :  { %1524 = vmatmul.mubr.msk.f32.vlgmr.msra.gmra.mrb[12].mxu1 %vm236_vm6, %v912_v35 }
0x13e4   :  { %1532 = vmatprep.mubr.msk.f32.mxu1 %vm1789_vm5, %v1785_v0  ;;  %1592 = vmatpush3.bf16.msra.mxu1 %v1591_v56 }
0x13e5   :  { %1530 = vmatprep.subr.mxu1 %v1785_v0 }
0x13e8   :  { %1531 = vmatpush3.msk.msra.mxu1 %vm78_vm1, %v62_v59 }
0x13e9   :  { %1593 = vmatprep.subr.bf16.mxu1 %v1788_v13 }
0x1445   :  { %v1014_v38 = vpop.permute.xlu0 %1013 }
0x1446   :  { %v1016_v39 = vmul.f32 %v1014_v38, %v1010_v37 }
0x1448   :  { %1676 = vtanh.f32 %v1016_v39 }
0x1452   :  { %v1677_v40 = vpop.eup %1676 }
0x1453   :  { %1019 = vrot.lane.b32.xlu0 %v1677_v40, %s1800_s6 }
0x14b6   :  { %v981_v20 = vpop.f32.mrb[12].mxu1 }
0x14b7   :  { %v985_v41 = vadd.f32 %v981_v20, %v232_v5  ;;  %v1525_v42 = vpop.f32.mrb[13].mxu1 }
0x14b9   :  { %1678 = vtanh.f32 %v985_v41 }
0x14ba   :  { %1680 = vtanh.f32 %v234_v52 }
0x14c3   :  { %v1679_v43 = vpop.eup %1678 }
0x14c4   :  { %991 = vrot.lane.b32.xlu1 %v1679_v43, %s1790_s23  ;;  %v987_v46 = vmul.f32 0.5, %v1679_v43  ;;  %v1681_v17 = vpop.eup %1680 }
0x14c5   :  { %v1020_v44 = vpop.permute.xlu0 %1019  ;;  %v1009_v60 = vmul.f32 0.5, %v1681_v17 }
0x14c6   :  { %v1022_v45 = vmul.f32 %v1020_v44, %v1010_v37  ;;  %v988_v47 = vadd.f32 0.5, %v987_v46 }
0x14c7   :  { %v1011_v61 = vadd.f32 0.5, %v1009_v60 }
0x14c8   :  { %1026 = vrot.lane.b32.xlu0 %v1022_v45, %s1801_s7  ;;  %v989_v55 = vmul.f32 %v988_v47, %v903_v27  ;;  %v68_v27 = vld [vmem:[#allocation7 + $0x70] sm:$0xff] }
0x14c9   :  { %v1023_v12 = vmul.f32 %v1020_v44, %v1011_v61  ;;  %v1600_v29 = vpack.c.bf16 %v69_v28, %v68_v27 }
0x1536   :  { %v992_v48 = vpop.permute.xlu1 %991 }
0x1537   :  { %v994_v49 = vmul.f32 %v992_v48, %v988_v47 }
0x1539   :  { %996 = vrot.lane.b32.xlu1 %v994_v49, %s1791_s24 }
0x153a   :  { %v1027_v3 = vpop.permute.xlu0 %1026 }
0x15ab   :  { %v997_v57 = vpop.permute.xlu1 %996 }
0x15ac   :  { %v999_v58 = vadd.f32 %v997_v57, %v989_v55 }
0x15ae   :  { %1682 = vtanh.f32 %v999_v58 }
0x15b8   :  { %v1683_v19 = vpop.eup %1682 }
0x15b9   :  { %1002 = vrot.lane.b32.xlu1 %v1683_v19, %s1792_s25 }
0x15bd   :  { %1028 = vrot.lane.b32.xlu1 %v1023_v12, %s1801_s7 }
0x162b   :  { %v1003_v62 = vpop.permute.xlu1 %1002 }
0x162c   :  { %v1005_v1 = vmul.f32 %v1003_v62, %v988_v47 }
0x162e   :  { %1108 = vrot.lane.b32.xlu0 %v1005_v1, %s1793_s26 }
0x162f   :  { %v1029_v4 = vpop.permute.xlu1 %1028 }
0x1630   :  { %v1031_v6 = vsel %vm1030_vm7, %v1027_v3, %v1029_v4 }
0x1631   :  { %1533 = vmatmul.mubr.msk.f32.vlgmr.msra.gmra.mrb[14].mxu1 %vm236_vm6, %v1031_v6 }
0x1632   :  { %1595 = vmatpush3.bf16.msra.mxu1 %v1594_v2  ;;  %1541 = vmatprep.mubr.msk.f32.mxu1 %vm1789_vm5, %v1785_v0 }
0x1633   :  { %1539 = vmatprep.subr.mxu1 %v1785_v0 }
0x1636   :  { %1540 = vmatpush3.msk.msra.mxu1 %vm78_vm1, %v59_v7 }
0x1637   :  { %1596 = vmatprep.subr.bf16.mxu1 %v1788_v13 }
0x16a0   :  { %v1109_v8 = vpop.permute.xlu0 %1108 }
0x16a1   :  { %1542 = vmatmul.mubr.msk.f32.vlgmr.msra.gmra.mrb[16].mxu1 %vm236_vm6, %v1109_v8 }
0x16a2   :  { %1550 = vmatprep.mubr.msk.f32.mxu1 %vm1789_vm5, %v1785_v0  ;;  %1598 = vmatpush3.bf16.msra.mxu1 %v1597_v11 }
0x16a3   :  { %1548 = vmatprep.subr.mxu1 %v1785_v0 }
0x16a6   :  { %1549 = vmatpush3.msk.msra.mxu1 %vm78_vm1, %v66_v15 }
0x16a7   :  { %1599 = vmatprep.subr.bf16.mxu1 %v1788_v13  ;;  %v1401_v13 = vld [vmem:[#allocation7 + $0x68] ss:$0 sm:$0xff] }
0x1704   :  { %v1103_v16 = vpop.f32.mrb[14].mxu1 }
0x1705   :  { %v1534_v18 = vpop.f32.mrb[15].mxu1 }
0x1774   :  { %v1181_v22 = vpop.f32.mrb[16].mxu1 }
0x1775   :  { %v1182_v23 = vadd.f32 %v1181_v22, %v1103_v16  ;;  %v1543_v24 = vpop.f32.mrb[17].mxu1 }
0x1777   :  { %v1189_v25 = vadd.f32 %v1400_v21, %v1182_v23 }
0x1779   :  { %v1190_v26 = vmax.f32 %v1189_v25, 0.0 }
0x177b   :  { %1551 = vmatmul.mubr.msk.f32.vlgmr.msra.gmra.mrb[18].mxu1 %vm236_vm6, %v1190_v26 }
0x177c   :  { %1557 = vmatprep.mubr.msk.f32.mxu1 %vm1789_vm5, %v1785_v0  ;;  %1602 = vmatpush3.bf16.msk.msra.mxu1 %vm1601_vm9, %v1600_v29 }
0x184e   :  { %v1267_v30 = vpop.f32.mrb[18].mxu1 }
0x184f   :  { %v1268_v31 = vadd.f32 %v1401_v13, %v1267_v30  ;;  %v1552_v32 = vpop.f32.mrb[19].mxu1 }
0x1851   :  { %v1271_v5 = vmax.f32 %v1268_v31, 0.0 }
0x1853   :  { %1558 = vmatmul.mubr.msk.f32.vlgmr.msra.gmra.mrb[20].mxu1 %vm1276_vm10, %v1271_v5 }
0x1926   :  { %v1350_v34 = vpop.f32.mrb[20].mxu1 }
0x1927   :  { %v1351_v35 = vadd.f32 %v1404_v33, %v1350_v34  ;;  %v1559_v0 = vpop.f32.mrb[21].mxu1 }
0x1929   :  { %1354 = vst [vmem:[#allocation8] sm:$0xff] %v1351_v35 }
0x192a   :  { %1761 = shalt.err (!%p1758_p0)
}
0x192b   :  { %s1762_s12 = scalar_lea.hbm %s2055_s3, 128 }
0x192c   :  { %p1763_p1 = scmp.ne.s32.totalorder %s2055_s3, %s1762_s12  ;;  %p1766_p2 = scmp.lt.u32.totalorder %s1762_s12, %s2055_s3 }
0x192e   :  { %p1768_p3 = pnand %p1766_p2, %p1763_p1 }
0x1930   :  { %1771 = shalt.err (!%p1768_p3)
}
0x1931   :  { %1364 = dma.vmem_to_hbm [thread:$0]  %s1362_s9, 128, %s2055_s3, [#allocation4]  }
0x1932   :  { %1776 = dma.done.wait [#allocation4], 128  }
0x1933   :  { %1777 = vsyncadd [#allocation4], 4294967168 }
0x1934   :  { %1368 = vsyncpa [#allocation3], 1 }
0x1935   :  { %1369 = vsyncpa [#allocation6], 1 }
0x1936   :  { %1370 = vsyncpa [#allocation4], 1 }

</bundles_post_ra>
